<compile_context>
chip_gen: v6e
topology: v6e:2x2x1
jax: 0.10.0
libtpu: 0.0.40
codegen_flags: <defaults>
</compile_context>

<pallas_src>
import jax
import jax.numpy as jnp
from jax.experimental import pallas as pl
from jax.experimental.pallas import tpu as pltpu

A = 25          # hidden width from the module (a = 25)
IN_DIM = 2      # cat([t, x], axis=1) -> 2 input features
OUT_DIM = 4     # output_layer: Linear(a, 4)


def aux_net_kernel(t_ref, x_ref,
                   w1_ref, b1_ref,
                   w2_ref, b2_ref,
                   w3_ref, b3_ref,
                   wo_ref, bo_ref,
                   out_ref):
    # Feature-major: all activations are (features, TN), batch on the lane axis.
    t_row = t_ref[...]                                   # (1, TN)
    x_row = x_ref[...]                                   # (1, TN)

    # Layer 1 (K=2): skip the MXU, use two rank-1 broadcast FMAs on the VPU.
    w1 = w1_ref[...]                                     # (A, 2), (out, in)
    h = jnp.tanh(w1[:, 0:1] * t_row + w1[:, 1:2] * x_row + b1_ref[...])   # (A, TN)

    # Layers 2/3: (A, A) @ (A, TN) on the MXU, lane-dense result, f32 operands.
    h = jnp.tanh(jnp.dot(w2_ref[...], h,
                         preferred_element_type=jnp.float32) + b2_ref[...])
    h = jnp.tanh(jnp.dot(w3_ref[...], h,
                         preferred_element_type=jnp.float32) + b3_ref[...])

    # Output layer: (4, A) @ (A, TN) -> (4, TN), still lane-dense on batch.
    out = jnp.dot(wo_ref[...], h,
                  preferred_element_type=jnp.float32) + bo_ref[...]
    out_ref[...] = out.astype(out_ref.dtype)


def aux_net_forward(t, x, params, *, tn=4096, feature_major_out=False):
    """t, x: (N, 1) float32.

    Returns (N, 4) float32 (matches Aux_Net.forward).  Pass
    feature_major_out=True to get the kernel-native (4, N) slab and skip the
    wrapper transpose entirely (preferred if the consumer can take it).
    """
    n = t.shape[0]
    (w1, b1), (w2, b2), (w3, b3), (wo, bo) = params

    # Batch tile: lane-aligned (multiple of 128), as large as tn, but no larger
    # than ceil(N/2) rounded up to 128 so there are >= 2 grid steps whenever N
    # allows it (megacore occupancy on v7x; harmless on single-TC v5e/v6e).
    half_n = pl.cdiv(pl.cdiv(n, 2), 128) * 128
    block_n = max(128, min(tn, half_n))
    grid = (pl.cdiv(n, block_n),)

    # Feature-major (1, N) rows — reshape of a contiguous (N, 1) array is free.
    t_row = jnp.reshape(t.astype(jnp.float32), (1, n))
    x_row = jnp.reshape(x.astype(jnp.float32), (1, n))

    def full_spec(arr):
        # Tiny parameter, grid-invariant block index -> fetched once, resident.
        nd = arr.ndim
        return pl.BlockSpec(arr.shape, lambda *_: (0,) * nd)

    grid_spec = pltpu.PrefetchScalarGridSpec(
        num_scalar_prefetch=0,
        grid=grid,
        in_specs=[
            pl.BlockSpec((1, block_n), lambda i: (0, i)),   # t row
            pl.BlockSpec((1, block_n), lambda i: (0, i)),   # x row
            full_spec(w1), full_spec(b1),
            full_spec(w2), full_spec(b2),
            full_spec(w3), full_spec(b3),
            full_spec(wo), full_spec(bo),
        ],
        out_specs=pl.BlockSpec((OUT_DIM, block_n), lambda i: (0, i)),
    )

    out_fm = pl.pallas_call(
        aux_net_kernel,
        out_shape=jax.ShapeDtypeStruct((OUT_DIM, n), jnp.float32),
        grid_spec=grid_spec,
        compiler_params=pltpu.CompilerParams(
            dimension_semantics=("parallel",),        # megacore sharding on v7x
            vmem_limit_bytes=32 * 1024 * 1024),       # headroom for large tn on v5e
    )(t_row, x_row, w1, b1, w2, b2, w3, b3, wo, bo)

    if feature_major_out:
        return out_fm                                  # (4, N), lane-dense
    # Layout plumbing back to the module's (N, 4) convention (costs one
    # transpose pass; prefer feature_major_out=True when the consumer allows).
    return out_fm.T


def init_params(key):
    """Deterministic init mimicking nn.Linear default U(-1/sqrt(fan_in), +...).
    Weights in PyTorch-native (out, in) orientation; biases as (out, 1)."""
    dims = [(IN_DIM, A), (A, A), (A, A), (A, OUT_DIM)]
    params = []
    for fan_in, fan_out in dims:
        key, kw, kb = jax.random.split(key, 3)
        bound = 1.0 / jnp.sqrt(float(fan_in))
        w = jax.random.uniform(kw, (fan_out, fan_in), jnp.float32, -bound, bound)
        b = jax.random.uniform(kb, (fan_out, 1), jnp.float32, -bound, bound)
        params.append((w, b))
    return params
    # NOTE: hidden layers 4-8 exist in __init__ but are unused in forward(),
    # so they are intentionally not instantiated here.


def reference_forward(t, x, params):
    """Pure-JAX reference in the module's batch-major convention."""
    inputs = jnp.concatenate([t, x], axis=1)             # (N, 2)
    (w1, b1), (w2, b2), (w3, b3), (wo, bo) = params      # W: (out,in), b: (out,1)
    h = jnp.tanh(inputs @ w1.T + b1.T)
    h = jnp.tanh(h @ w2.T + b2.T)
    h = jnp.tanh(h @ w3.T + b3.T)
    return h @ wo.T + bo.T


if __name__ == "__main__":
    key = jax.random.PRNGKey(0)
    kp, kt, kx = jax.random.split(key, 3)

    N = 16  # small batch of collocation points
    t = jax.random.normal(kt, (N, 1), jnp.float32)
    x = jax.random.normal(kx, (N, 1), jnp.float32)
    params = init_params(kp)

    # Default path: (N, 4), matches Aux_Net.forward semantics.
    out = jax.block_until_ready(aux_net_forward(t, x, params))
    ref = reference_forward(t, x, params)
    assert out.shape == (N, OUT_DIM)
    assert jnp.allclose(out, ref, atol=1e-5, rtol=1e-5)

    # Feature-major fast path: (4, N), no wrapper transpose.
    out_fm = jax.block_until_ready(
        aux_net_forward(t, x, params, feature_major_out=True))
    assert out_fm.shape == (OUT_DIM, N)
    assert jnp.allclose(out_fm.T, ref, atol=1e-5, rtol=1e-5)

    # Exercise the padless ragged-grid path with >= 2 grid steps.
    N2 = 300
    kt2, kx2 = jax.random.split(kx)
    t2 = jax.random.normal(kt2, (N2, 1), jnp.float32)
    x2 = jax.random.normal(kx2, (N2, 1), jnp.float32)
    out2 = jax.block_until_ready(aux_net_forward(t2, x2, params))
    ref2 = reference_forward(t2, x2, params)
    assert out2.shape == (N2, OUT_DIM)
    assert jnp.allclose(out2, ref2, atol=1e-5, rtol=1e-5)

    print("KERNEL_OK")
</pallas_src>

<mosaic_0001>
module attributes {stable_mosaic.version = 11 : i64} {
  func.func @aux_net_kernel(%arg0: i32, %arg1: memref<1x128xf32, #tpu.memory_space<vmem>>, %arg2: memref<1x128xf32, #tpu.memory_space<vmem>>, %arg3: memref<25x2xf32, #tpu.memory_space<vmem>>, %arg4: memref<25x1xf32, #tpu.memory_space<vmem>>, %arg5: memref<25x25xf32, #tpu.memory_space<vmem>>, %arg6: memref<25x1xf32, #tpu.memory_space<vmem>>, %arg7: memref<25x25xf32, #tpu.memory_space<vmem>>, %arg8: memref<25x1xf32, #tpu.memory_space<vmem>>, %arg9: memref<4x25xf32, #tpu.memory_space<vmem>>, %arg10: memref<4x1xf32, #tpu.memory_space<vmem>>, %arg11: memref<4x128xf32, #tpu.memory_space<vmem>>) attributes {dimension_semantics = [#tpu.dimension_semantics<parallel>], iteration_bounds = array<i64: 1>, scalar_prefetch = 0 : i64, scratch_operands = 0 : i64, tpu.core_type = #tpu.core_type<tc>, window_params = [{transform_indices = @transform_0, window_bounds = array<i64: 1, 128>}, {transform_indices = @transform_1, window_bounds = array<i64: 1, 128>}, {pipeline_mode = #tpu.pipeline_mode<synchronous>, transform_indices = @transform_2, window_bounds = array<i64: 25, 2>}, {pipeline_mode = #tpu.pipeline_mode<synchronous>, transform_indices = @transform_3, window_bounds = array<i64: 25, 1>}, {pipeline_mode = #tpu.pipeline_mode<synchronous>, transform_indices = @transform_4, window_bounds = array<i64: 25, 25>}, {pipeline_mode = #tpu.pipeline_mode<synchronous>, transform_indices = @transform_5, window_bounds = array<i64: 25, 1>}, {pipeline_mode = #tpu.pipeline_mode<synchronous>, transform_indices = @transform_6, window_bounds = array<i64: 25, 25>}, {pipeline_mode = #tpu.pipeline_mode<synchronous>, transform_indices = @transform_7, window_bounds = array<i64: 25, 1>}, {pipeline_mode = #tpu.pipeline_mode<synchronous>, transform_indices = @transform_8, window_bounds = array<i64: 4, 25>}, {pipeline_mode = #tpu.pipeline_mode<synchronous>, transform_indices = @transform_9, window_bounds = array<i64: 4, 1>}, {transform_indices = @transform_10, window_bounds = array<i64: 4, 128>}]} {
    %c0 = arith.constant 0 : index
    %c0_0 = arith.constant 0 : index
    %0 = vector.load %arg1[%c0, %c0_0] : memref<1x128xf32, #tpu.memory_space<vmem>>, vector<1x128xf32>
    %c0_1 = arith.constant 0 : index
    %c0_2 = arith.constant 0 : index
    %1 = vector.load %arg2[%c0_1, %c0_2] : memref<1x128xf32, #tpu.memory_space<vmem>>, vector<1x128xf32>
    %c0_3 = arith.constant 0 : index
    %c0_4 = arith.constant 0 : index
    %2 = vector.load %arg3[%c0_3, %c0_4] : memref<25x2xf32, #tpu.memory_space<vmem>>, vector<25x2xf32>
    %3 = vector.extract_strided_slice %2 {offsets = [0, 0], sizes = [25, 1], strides = [1, 1]} : vector<25x2xf32> to vector<25x1xf32>
    %4 = vector.broadcast %3 : vector<25x1xf32> to vector<25x128xf32>
    %5 = vector.broadcast %0 : vector<1x128xf32> to vector<25x128xf32>
    %6 = arith.mulf %4, %5 : vector<25x128xf32>
    %7 = vector.extract_strided_slice %2 {offsets = [0, 1], sizes = [25, 1], strides = [1, 1]} : vector<25x2xf32> to vector<25x1xf32>
    %8 = vector.broadcast %7 : vector<25x1xf32> to vector<25x128xf32>
    %9 = vector.broadcast %1 : vector<1x128xf32> to vector<25x128xf32>
    %10 = arith.mulf %8, %9 : vector<25x128xf32>
    %11 = arith.addf %6, %10 : vector<25x128xf32>
    %c0_5 = arith.constant 0 : index
    %c0_6 = arith.constant 0 : index
    %12 = vector.load %arg4[%c0_5, %c0_6] : memref<25x1xf32, #tpu.memory_space<vmem>>, vector<25x1xf32>
    %13 = vector.broadcast %12 : vector<25x1xf32> to vector<25x128xf32>
    %14 = arith.addf %11, %13 : vector<25x128xf32>
    %15 = math.tanh %14 : vector<25x128xf32>
    %c0_7 = arith.constant 0 : index
    %c0_8 = arith.constant 0 : index
    %16 = vector.load %arg5[%c0_7, %c0_8] : memref<25x25xf32, #tpu.memory_space<vmem>>, vector<25x25xf32>
    %cst = arith.constant dense<0.000000e+00> : vector<25x128xf32>
    %17 = tpu.matmul %16, %15, %cst {dimension_numbers = #tpu.dot_dimension_numbers<[1], [0], [0], [1], [0, 0, 1, 1], [], []>} : vector<25x25xf32>, vector<25x128xf32>, vector<25x128xf32> -> vector<25x128xf32>
    %c0_9 = arith.constant 0 : index
    %c0_10 = arith.constant 0 : index
    %18 = vector.load %arg6[%c0_9, %c0_10] : memref<25x1xf32, #tpu.memory_space<vmem>>, vector<25x1xf32>
    %19 = vector.broadcast %18 : vector<25x1xf32> to vector<25x128xf32>
    %20 = arith.addf %17, %19 : vector<25x128xf32>
    %21 = math.tanh %20 : vector<25x128xf32>
    %c0_11 = arith.constant 0 : index
    %c0_12 = arith.constant 0 : index
    %22 = vector.load %arg7[%c0_11, %c0_12] : memref<25x25xf32, #tpu.memory_space<vmem>>, vector<25x25xf32>
    %cst_13 = arith.constant dense<0.000000e+00> : vector<25x128xf32>
    %23 = tpu.matmul %22, %21, %cst_13 {dimension_numbers = #tpu.dot_dimension_numbers<[1], [0], [0], [1], [0, 0, 1, 1], [], []>} : vector<25x25xf32>, vector<25x128xf32>, vector<25x128xf32> -> vector<25x128xf32>
    %c0_14 = arith.constant 0 : index
    %c0_15 = arith.constant 0 : index
    %24 = vector.load %arg8[%c0_14, %c0_15] : memref<25x1xf32, #tpu.memory_space<vmem>>, vector<25x1xf32>
    %25 = vector.broadcast %24 : vector<25x1xf32> to vector<25x128xf32>
    %26 = arith.addf %23, %25 : vector<25x128xf32>
    %27 = math.tanh %26 : vector<25x128xf32>
    %c0_16 = arith.constant 0 : index
    %c0_17 = arith.constant 0 : index
    %28 = vector.load %arg9[%c0_16, %c0_17] : memref<4x25xf32, #tpu.memory_space<vmem>>, vector<4x25xf32>
    %cst_18 = arith.constant dense<0.000000e+00> : vector<4x128xf32>
    %29 = tpu.matmul %28, %27, %cst_18 {dimension_numbers = #tpu.dot_dimension_numbers<[1], [0], [0], [1], [0, 0, 1, 1], [], []>} : vector<4x25xf32>, vector<25x128xf32>, vector<4x128xf32> -> vector<4x128xf32>
    %c0_19 = arith.constant 0 : index
    %c0_20 = arith.constant 0 : index
    %30 = vector.load %arg10[%c0_19, %c0_20] : memref<4x1xf32, #tpu.memory_space<vmem>>, vector<4x1xf32>
    %31 = vector.broadcast %30 : vector<4x1xf32> to vector<4x128xf32>
    %32 = arith.addf %29, %31 : vector<4x128xf32>
    %c0_21 = arith.constant 0 : index
    %c0_22 = arith.constant 0 : index
    %33 = vector.load %arg11[%c0_21, %c0_22] : memref<4x128xf32, #tpu.memory_space<vmem>>, vector<4x128xf32>
    tpu.vector_store %arg11[%c0_21, %c0_22], %32 {strides = array<i32>} : memref<4x128xf32, #tpu.memory_space<vmem>>, vector<4x128xf32>,
    return
  }
  func.func @transform_0(%arg0: i32) -> (i32, i32) {
    %c0_i32 = arith.constant 0 : i32
    %c0_i32_0 = arith.constant 0 : i32
    return %c0_i32, %arg0 : i32, i32
  }
  func.func @transform_1(%arg0: i32) -> (i32, i32) {
    %c0_i32 = arith.constant 0 : i32
    %c0_i32_0 = arith.constant 0 : i32
    return %c0_i32, %arg0 : i32, i32
  }
  func.func @transform_2(%arg0: i32) -> (i32, i32) {
    %c0_i32 = arith.constant 0 : i32
    %c0_i32_0 = arith.constant 0 : i32
    %c0_i32_1 = arith.constant 0 : i32
    return %c0_i32, %c0_i32_0 : i32, i32
  }
  func.func @transform_3(%arg0: i32) -> (i32, i32) {
    %c0_i32 = arith.constant 0 : i32
    %c0_i32_0 = arith.constant 0 : i32
    %c0_i32_1 = arith.constant 0 : i32
    return %c0_i32, %c0_i32_0 : i32, i32
  }
  func.func @transform_4(%arg0: i32) -> (i32, i32) {
    %c0_i32 = arith.constant 0 : i32
    %c0_i32_0 = arith.constant 0 : i32
    %c0_i32_1 = arith.constant 0 : i32
    return %c0_i32, %c0_i32_0 : i32, i32
  }
  func.func @transform_5(%arg0: i32) -> (i32, i32) {
    %c0_i32 = arith.constant 0 : i32
    %c0_i32_0 = arith.constant 0 : i32
    %c0_i32_1 = arith.constant 0 : i32
    return %c0_i32, %c0_i32_0 : i32, i32
  }
  func.func @transform_6(%arg0: i32) -> (i32, i32) {
    %c0_i32 = arith.constant 0 : i32
    %c0_i32_0 = arith.constant 0 : i32
    %c0_i32_1 = arith.constant 0 : i32
    return %c0_i32, %c0_i32_0 : i32, i32
  }
  func.func @transform_7(%arg0: i32) -> (i32, i32) {
    %c0_i32 = arith.constant 0 : i32
    %c0_i32_0 = arith.constant 0 : i32
    %c0_i32_1 = arith.constant 0 : i32
    return %c0_i32, %c0_i32_0 : i32, i32
  }
  func.func @transform_8(%arg0: i32) -> (i32, i32) {
    %c0_i32 = arith.constant 0 : i32
    %c0_i32_0 = arith.constant 0 : i32
    %c0_i32_1 = arith.constant 0 : i32
    return %c0_i32, %c0_i32_0 : i32, i32
  }
  func.func @transform_9(%arg0: i32) -> (i32, i32) {
    %c0_i32 = arith.constant 0 : i32
    %c0_i32_0 = arith.constant 0 : i32
    %c0_i32_1 = arith.constant 0 : i32
    return %c0_i32, %c0_i32_0 : i32, i32
  }
  func.func @transform_10(%arg0: i32) -> (i32, i32) {
    %c0_i32 = arith.constant 0 : i32
    %c0_i32_0 = arith.constant 0 : i32
    return %c0_i32, %arg0 : i32, i32
  }
}

</mosaic_0001>

<bundles_post_ra>
// kernel: tpu_custom_call.1
= control target key start
LH: loop header
LB: loop body
LE: loop exit
PB: predicated region body
PF: predicated region fallthrough
CT: control target
= control target key end

     0   :  { %v630_v2 = vmov 1   ;;  %v631_v3 = vmov 0   ;;  %s791_s0 = inlined_call_operand.vmem [shape: f32[1,16], index: 0, kind: input, shape index: {}]   ;;  %s792_s1 = inlined_call_operand.vmem [shape: f32[1,16], index: 1, kind: input, shape index: {}]   ;;  %s793_s2 = inlined_call_operand.vmem [shape: f32[25,2], index: 2, kind: input, shape index: {}]   ;;  %s794_s3 = inlined_call_operand.vmem [shape: f32[25,1], index: 3, kind: input, shape index: {}]   ;;  %s795_s4 = inlined_call_operand.vmem [shape: f32[25,25], index: 4, kind: input, shape index: {}]   ;;  %s796_s5 = inlined_call_operand.vmem [shape: f32[25,1], index: 5, kind: input, shape index: {}]   ;;  %s797_s6 = inlined_call_operand.vmem [shape: f32[25,25], index: 6, kind: input, shape index: {}]   ;;  %s798_s7 = inlined_call_operand.vmem [shape: f32[25,1], index: 7, kind: input, shape index: {}]   ;;  %s799_s8 = inlined_call_operand.vmem [shape: f32[4,25], index: 8, kind: input, shape index: {}]   ;;  %s800_s9 = inlined_call_operand.vmem [shape: f32[4,1], index: 9, kind: input, shape index: {}]   ;;  %s801_s10 = inlined_call_operand.hbm [shape: f32[4,16], index: 10, kind: output, shape index: {}]  }
   0x1   :  { %v41_v0 = vld [vmem:[%s793_s2 + $0x18] sm:$0x1]  ;;  %v40_v1 = vld [vmem:[%s793_s2 + $0x10] sm:$0xff]  ;;  %577 = vset.pattern.permute.xlu0 %v630_v2  ;;  %578 = vset.pattern.permute.xlu1 %v631_v3  ;;  %v39_v4 = vld [vmem:[%s793_s2 + $0x8] sm:$0xff] }
   0x2   :  { %85 = vperm.xlu0 %577, %v41_v0   ;;  %54 = vperm.xlu1 %578, %v40_v1  }
   0x6   :  { %579 = vset.pattern.permute.xlu1 %v630_v2  ;;  %77 = vperm.xlu0 %577, %v39_v4  }
   0x7   :  { %15 = vsyncpa [#allocation3], 0  ;;  %81 = vperm.xlu1 %579, %v40_v1   ;;  %v38_v5 = vld [vmem:[%s793_s2] sm:$0xff]  ;;  %v105_v6 = vld [vmem:[%s794_s3 + $0x18] sm:$0x1]  ;;  %vm162_vm0 = vcmask 203776  }
   0x8   :  { %v103_v7 = vld [vmem:[%s794_s3 + $0x8] sm:$0xff]  ;;  %v141_v8 = vld [vmem:[%s796_s5 + $0x18] sm:$0x1]  ;;  %v104_v9 = vld [vmem:[%s794_s3 + $0x10] sm:$0xff]  ;;  %vm175_vm1 = vcmask 1040384   ;;  %vm633_vm2 = vmmov 0  }
   0x9   :  { %v139_v10 = vld [vmem:[%s796_s5 + $0x8] sm:$0xff]  ;;  %v102_v11 = vld [vmem:[%s794_s3] sm:$0xff]  ;;  %v275_v12 = vld [vmem:[%s798_s7 + $0x18] sm:$0x1]  ;;  %s634_s19 = smov [#allocation2]  }
   0xa   :  { %581 = vset.pattern.permute.xlu0 %v631_v3  ;;  %v140_v13 = vld [vmem:[%s796_s5 + $0x10] sm:$0xff]  ;;  %v273_v14 = vld [vmem:[%s798_s7 + $0x8] sm:$0xff]  ;;  %v138_v15 = vld [vmem:[%s796_s5] sm:$0xff]  ;;  %s490_s3 = sshll.u32 %s634_s19, 4  ;;  %s491_s3 = int_to_ptr.vmem [resolvable:$true] %s490_s3 }
   0xb   :  { %580 = vset.pattern.permute.xlu1 %v631_v3  ;;  %59 = vperm.xlu0 %581, %v41_v0   ;;  %v401_v16 = vld [vmem:[%s800_s9] sm:$0xf]  ;;  %v274_v17 = vld [vmem:[%s798_s7 + $0x10] sm:$0xff]  ;;  %v135_v54 = vld [vmem:[%s795_s4 + $0x8] sm:$0xff]  ;;  %s608_s20 = scalar_lea.vmem %s491_s3, 64  ;;  %p613_p1 = scmp.lt.s32.totalorder %s491_s3, %s491_s3 }
   0xc   :  { %49 = vperm.xlu1 %580, %v39_v4   ;;  %v134_v18 = vld [vmem:[%s795_s4] sm:$0xff]  ;;  %v136_v55 = vld [vmem:[%s795_s4 + $0x10] sm:$0xff]  ;;  %v137_v56 = vld [vmem:[%s795_s4 + $0x18] sm:$0x1]  ;;  %p609_p0 = scmp.ne.s32.totalorder %s491_s3, %s608_s20  ;;  %p614_p2 = scmp.lt.s32.totalorder %s608_s20, %s608_s20 }
   0xd   :  { %v272_v19 = vld [vmem:[%s798_s7] sm:$0xff]  ;;  %541 = vmatprep.mubr.msk.f32.mxu0 %vm162_vm0, %v134_v18 }
   0xe   :  { %v499_v24 = vld [vmem:[%s792_s1] ss:$0 sm:$0xff]  ;;  %p615_p3 = por %p614_p2, %p613_p1 }
   0xf   :  { %44 = vperm.xlu0 %581, %v38_v5   ;;  %v498_v26 = vld [vmem:[%s791_s0] ss:$0 sm:$0xff] }
  0x10   :  { %123 = vperm.xlu1 %580, %v105_v6   ;;  %v268_v57 = vld [vmem:[%s797_s6] sm:$0xff]  ;;  %p616_p4 = pnand %p615_p3, %p609_p0 }
  0x11   :  { %555 = vmatprep.mubr.msk.f32.mxu1 %vm162_vm0, %v268_v57 }
  0x13   :  { %113 = vperm.xlu0 %581, %v103_v7  }
  0x14   :  { %582 = vset.pattern.permute.xlu1 %v630_v2 }
  0x15   :  { %73 = vperm.xlu1 %582, %v38_v5  }
  0x17   :  { %159 = vperm.xlu0 %581, %v141_v8  }
  0x19   :  { %583 = vset.pattern.permute.xlu1 %v631_v3 }
  0x1a   :  { %118 = vperm.xlu1 %583, %v104_v9  }
  0x1b   :  { %149 = vperm.xlu0 %581, %v139_v10   ;;  %v269_v10 = vld [vmem:[%s797_s6 + $0x8] sm:$0xff] }
  0x1e   :  { %108 = vperm.xlu1 %583, %v102_v11   ;;  %v270_v11 = vld [vmem:[%s797_s6 + $0x10] sm:$0xff] }
  0x1f   :  { %293 = vperm.xlu0 %581, %v275_v12   ;;  %v271_v12 = vld [vmem:[%s797_s6 + $0x18] sm:$0x1] }
  0x22   :  { %154 = vperm.xlu1 %583, %v140_v13   ;;  %v632_v13 = vmov 0.0  }
  0x23   :  { %283 = vperm.xlu0 %581, %v273_v14  }
  0x26   :  { %144 = vperm.xlu1 %583, %v138_v15  }
  0x27   :  { %404 = vperm.xlu0 %581, %v401_v16  }
  0x2a   :  { %288 = vperm.xlu1 %583, %v274_v17  }
  0x2e   :  { %278 = vperm.xlu1 %583, %v272_v19  }
  0x7d   :  { %v55_v20 = vpop.permute.xlu1 %54  ;;  %v86_v21 = vpop.permute.xlu0 %85 }
  0x7e   :  { %v97_v25 = vmul.f32 %v499_v24, %v86_v21  ;;  %v70_v38 = vmul.f32 %v498_v26, %v55_v20 }
  0x81   :  { %v78_v22 = vpop.permute.xlu0 %77 }
  0x82   :  { %v82_v23 = vpop.permute.xlu1 %81  ;;  %v95_v35 = vmul.f32 %v499_v24, %v78_v22 }
  0x83   :  { %v96_v34 = vmul.f32 %v499_v24, %v82_v23 }
  0x85   :  { %v100_v43 = vadd.f32 %v96_v34, %v70_v38 }
  0x86   :  { %v60_v27 = vpop.permute.xlu0 %59 }
  0x87   :  { %v71_v28 = vmul.f32 %v498_v26, %v60_v27  ;;  %v50_v29 = vpop.permute.xlu1 %49 }
  0x88   :  { %v69_v36 = vmul.f32 %v498_v26, %v50_v29  ;;  %v400_v29 = vld [vmem:[%s799_s8] sm:$0xf] }
  0x89   :  { %v101_v30 = vadd.f32 %v97_v25, %v71_v28 }
  0x8a   :  { %v45_v33 = vpop.permute.xlu0 %44  ;;  %v99_v41 = vadd.f32 %v95_v35, %v69_v36 }
  0x8b   :  { %v124_v31 = vpop.permute.xlu1 %123  ;;  %v68_v40 = vmul.f32 %v498_v26, %v45_v33 }
  0x8c   :  { %v129_v32 = vadd.f32 %v124_v31, %v101_v30 }
  0x8e   :  { %584 = vtanh.f32 %v129_v32  ;;  %v114_v39 = vpop.permute.xlu0 %113 }
  0x8f   :  { %v127_v45 = vadd.f32 %v114_v39, %v99_v41 }
  0x90   :  { %v74_v37 = vpop.permute.xlu1 %73 }
  0x91   :  { %v94_v42 = vmul.f32 %v499_v24, %v74_v37 }
  0x92   :  { %v160_v58 = vpop.permute.xlu0 %159 }
  0x93   :  { %v98_v47 = vadd.f32 %v94_v42, %v68_v40 }
  0x95   :  { %v119_v44 = vpop.permute.xlu1 %118 }
  0x96   :  { %v128_v46 = vadd.f32 %v119_v44, %v100_v43  ;;  %v150_v0 = vpop.permute.xlu0 %149 }
  0x98   :  { %586 = vtanh.f32 %v128_v46 }
  0x99   :  { %v109_v48 = vpop.permute.xlu1 %108  ;;  %588 = vtanh.f32 %v127_v45 }
  0x9a   :  { %v126_v49 = vadd.f32 %v109_v48, %v98_v47  ;;  %v294_v14 = vpop.permute.xlu0 %293 }
  0x9b   :  { %v585_v50 = vpop.eup %584 }
  0x9c   :  { %590 = vtanh.f32 %v126_v49  ;;  %533 = vmatprep.subr.msk.mxu0 %vm175_vm1, %v585_v50 }
  0x9d   :  { %534 = vmatpush3.msk.msra.mxu0 %vm175_vm1, %v585_v50  ;;  %v155_v60 = vpop.permute.xlu1 %154 }
  0x9e   :  { %v284_v20 = vpop.permute.xlu0 %283 }
  0xa1   :  { %v145_v4 = vpop.permute.xlu1 %144 }
  0xa2   :  { %v405_v31 = vpop.permute.xlu0 %404 }
  0xa5   :  { %v587_v51 = vpop.eup %586  ;;  %v289_v16 = vpop.permute.xlu1 %288 }
  0xa6   :  { %535 = vmatprep.subr.mxu0 %v587_v51  ;;  %v589_v52 = vpop.eup %588 }
  0xa7   :  { %536 = vmatpush3.msra.mxu0 %v587_v51 }
  0xa8   :  { %537 = vmatprep.subr.mxu0 %v589_v52 }
  0xa9   :  { %v591_v53 = vpop.eup %590  ;;  %538 = vmatpush3.msra.mxu0 %v589_v52  ;;  %v279_v24 = vpop.permute.xlu1 %278 }
  0xaa   :  { %539 = vmatprep.subr.mxu0 %v591_v53 }
  0xab   :  { %540 = vmatpush3.msra.mxu0 %v591_v53 }
  0xac   :  { %542 = vmatmul.mubr.msk.f32.vlgmr.msra.gmra.mxu0 %vm162_vm0, %v135_v54  ;;  %561 = vmatprep.subr.mxu0 %v632_v13 }
  0xad   :  { %544 = vmatprep.mubr.msk.f32.mxu0 %vm162_vm0, %v136_v55 }
  0xb0   :  { %545 = vmatmul.mubr.msk.f32.gmra.mxu0 %vm162_vm0, %v137_v56 }
  0xb1   :  { %569 = vmatprep.mubr.msk.f32.mxu0 %vm633_vm2, %v632_v13 }
 0x16c   :  { %v543_v59 = vpop.f32.mrf.mxu0 }
 0x16d   :  { %v251_v2 = vadd.f32 %v543_v59, %v150_v0 }
 0x16e   :  { %v245_v61 = vpop.f32.mrf.mxu0 }
 0x16f   :  { %v246_v5 = vadd.f32 %v245_v61, %v145_v4 }
 0x170   :  { %v546_v62 = vpop.f32.mrf.mxu0 }
 0x171   :  { %v261_v63 = vadd.f32 %v546_v62, %v160_v58 }
 0x172   :  { %v255_v1 = vpop.f32.mrf.mxu0 }
 0x173   :  { %592 = vtanh.f32 %v261_v63  ;;  %v256_v3 = vadd.f32 %v255_v1, %v155_v60 }
 0x175   :  { %594 = vtanh.f32 %v256_v3 }
 0x176   :  { %596 = vtanh.f32 %v251_v2 }
 0x177   :  { %598 = vtanh.f32 %v246_v5 }
 0x180   :  { %v593_v6 = vpop.eup %592 }
 0x181   :  { %547 = vmatprep.subr.msk.mxu1 %vm175_vm1, %v593_v6 }
 0x182   :  { %v595_v7 = vpop.eup %594  ;;  %548 = vmatpush3.msk.msra.mxu1 %vm175_vm1, %v593_v6 }
 0x183   :  { %549 = vmatprep.subr.mxu1 %v595_v7  ;;  %v597_v8 = vpop.eup %596 }
 0x184   :  { %550 = vmatpush3.msra.mxu1 %v595_v7  ;;  %v599_v9 = vpop.eup %598 }
 0x185   :  { %551 = vmatprep.subr.mxu1 %v597_v8 }
 0x186   :  { %552 = vmatpush3.msra.mxu1 %v597_v8 }
 0x187   :  { %553 = vmatprep.subr.mxu1 %v599_v9 }
 0x188   :  { %554 = vmatpush3.msra.mxu1 %v599_v9 }
 0x189   :  { %556 = vmatmul.mubr.msk.f32.vlgmr.msra.gmra.mxu1 %vm162_vm0, %v269_v10 }
 0x18a   :  { %558 = vmatprep.mubr.msk.f32.mxu1 %vm162_vm0, %v270_v11 }
 0x18d   :  { %559 = vmatmul.mubr.msk.f32.gmra.mxu1 %vm162_vm0, %v271_v12 }
 0x249   :  { %v557_v15 = vpop.f32.mrf.mxu1 }
 0x24a   :  { %v383_v22 = vadd.f32 %v557_v15, %v284_v20 }
 0x24b   :  { %v377_v17 = vpop.f32.mrf.mxu1 }
 0x24c   :  { %v378_v25 = vadd.f32 %v377_v17, %v279_v24 }
 0x24d   :  { %v560_v18 = vpop.f32.mrf.mxu1 }
 0x24e   :  { %v393_v19 = vadd.f32 %v560_v18, %v294_v14 }
 0x24f   :  { %v387_v21 = vpop.f32.mrf.mxu1 }
 0x250   :  { %600 = vtanh.f32 %v393_v19  ;;  %v388_v23 = vadd.f32 %v387_v21, %v289_v16 }
 0x252   :  { %602 = vtanh.f32 %v388_v23 }
 0x253   :  { %604 = vtanh.f32 %v383_v22 }
 0x254   :  { %606 = vtanh.f32 %v378_v25 }
 0x25d   :  { %v601_v26 = vpop.eup %600 }
 0x25e   :  { %562 = vmatpush3.msk.msra.mxu0 %vm175_vm1, %v601_v26 }
 0x25f   :  { %v603_v27 = vpop.eup %602  ;;  %563 = vmatprep.subr.mxu0 %v632_v13 }
 0x260   :  { %564 = vmatpush3.msra.mxu0 %v603_v27  ;;  %v605_v28 = vpop.eup %604 }
 0x261   :  { %565 = vmatprep.subr.mxu0 %v632_v13  ;;  %v607_v30 = vpop.eup %606 }
 0x262   :  { %566 = vmatpush3.msra.mxu0 %v605_v28 }
 0x263   :  { %567 = vmatprep.subr.mxu0 %v632_v13 }
 0x264   :  { %568 = vmatpush3.msra.mxu0 %v607_v30 }
 0x265   :  { %570 = vmatmul.mubr.msk.f32.vlgmr.msra.gmra.mxu0 %vm162_vm0, %v400_v29 }
 0x325   :  { %v479_v32 = vpop.f32.mrf.mxu0 }
 0x326   :  { %v480_v33 = vadd.f32 %v479_v32, %v405_v31 }
 0x327   :  { %v571_v34 = vpop.f32.mrf.mxu0 }
 0x328   :  { %483 = vst [vmem:[#allocation2] sm:$0xf] %v480_v33 }
 0x329   :  { %619 = shalt.err (!%p616_p4)
}
 0x32a   :  { %493 = dma.vmem_to_hbm [thread:$0]  %s491_s3, 64, %s801_s10, [#allocation3]  }
 0x32b   :  { %628 = dma.done.wait [#allocation3], 64  }
 0x32c   :  { %629 = vsyncadd [#allocation3], 4294967232 }
 0x32d   :  { %497 = vsyncpa [#allocation3], 1 }

</bundles_post_ra>
